<compile_context>
chip_gen: v5e
topology: v5e:2x2
jax: 0.10.0
libtpu: 0.0.40
codegen_flags: <defaults>
</compile_context>

<pallas_src>
import functools

import jax
import jax.numpy as jnp
from jax import lax
from jax.experimental import pallas as pl
from jax.experimental.pallas import tpu as pltpu

LAMBD = 0.5
LANE = 128


def _softshrink(v, lambd):
    # Softshrink(lambda): v - l if v > l ; v + l if v < -l ; 0 otherwise (done in f32).
    return jnp.where(v > lambd, v - lambd, jnp.where(v < -lambd, v + lambd, 0.0))


def _fused_mlp_kernel(x_ref, w1_ref, b1_ref, w2_ref, b2_ref, w3_ref, b3_ref,
                      w4_ref, b4_ref, o_ref, *, lambd):
    """Whole (Linear -> Softshrink) x3 -> Linear forward on one VMEM-resident tile."""
    wdt = w1_ref.dtype  # matmul operand dtype (f32 or bf16); accumulation is f32
    h = x_ref[...].astype(wdt)
    h = _softshrink(
        jnp.dot(h, w1_ref[...], preferred_element_type=jnp.float32) + b1_ref[...], lambd)
    h = _softshrink(
        jnp.dot(h.astype(wdt), w2_ref[...], preferred_element_type=jnp.float32) + b2_ref[...], lambd)
    h = _softshrink(
        jnp.dot(h.astype(wdt), w3_ref[...], preferred_element_type=jnp.float32) + b3_ref[...], lambd)
    y = jnp.dot(h.astype(wdt), w4_ref[...], preferred_element_type=jnp.float32) + b4_ref[...]
    o_ref[...] = y.astype(o_ref.dtype)


def _pad_cols(a, multiple):
    pad = (-a.shape[-1]) % multiple
    if pad == 0:
        return a
    widths = [(0, 0)] * a.ndim
    widths[-1] = (0, pad)
    return jnp.pad(a, widths)


def softshrink_model(x, params, *, lambd=LAMBD, batch_tile=1024):
    """Forward pass. x: [B, input_size]; params: [(w, b)] * 4 with w: [Din, Dout]."""
    (w1, b1), (w2, b2), (w3, b3), (w4, b4) = params
    out_features = w4.shape[1]
    B, K = x.shape

    # Only the final layer's weights/bias get lane-padded (10 -> 128 columns,
    # ~120 KB, zeros so results are unchanged) so the output store is a full-lane
    # unmasked vst.  x and w1 stay unpadded: K=784 is already sublane-aligned and
    # the MXU K-pass count is identical to a 896 pad on every generation.
    w4p = _pad_cols(w4, LANE)
    b4p = _pad_cols(b4.reshape(1, -1), LANE)

    weights = [w1, w2, w3, w4p]
    biases = [b1.reshape(1, -1).astype(jnp.float32),
              b2.reshape(1, -1).astype(jnp.float32),
              b3.reshape(1, -1).astype(jnp.float32),
              b4p.astype(jnp.float32)]
    operands = []
    for w, b in zip(weights, biases):
        operands += [w, b]

    Doutp = w4p.shape[1]
    kernel = functools.partial(_fused_mlp_kernel, lambd=lambd)

    if B <= batch_tile:
        # Single invocation, no grid: no pipeliner/double-buffering, everything
        # (weights + activations, ~1.5 MB f32) lives in VMEM once.
        vmem = pl.BlockSpec(memory_space=pltpu.MemorySpace.VMEM)
        out_p = pl.pallas_call(
            kernel,
            out_shape=jax.ShapeDtypeStruct((B, Doutp), jnp.float32),
            in_specs=[vmem] * 9,
            out_specs=vmem,
        )(x, *operands)
    else:
        # Batch-tiled ragged grid (no batch padding): the last block's out-of-range
        # rows are don't-care on load and masked on store.  Weights/biases are
        # resident (index_map -> (0,0)) and single-buffered; the batch axis is
        # "parallel" so megacore / v7x's second TensorCore can shard it
        # (n_tiles >= 2 whenever this path is taken, since B > batch_tile).
        n_tiles = pl.cdiv(B, batch_tile)

        def resident(shape):
            return pl.BlockSpec(shape, lambda i: (0, 0),
                                pipeline_mode=pl.Buffered(1))

        in_specs = [pl.BlockSpec((batch_tile, K), lambda i: (i, 0))]
        for w, b in zip(weights, biases):
            in_specs += [resident(w.shape), resident(b.shape)]

        out_p = pl.pallas_call(
            kernel,
            out_shape=jax.ShapeDtypeStruct((B, Doutp), jnp.float32),
            grid=(n_tiles,),
            in_specs=in_specs,
            out_specs=pl.BlockSpec((batch_tile, Doutp), lambda i: (i, 0)),
            compiler_params=pltpu.CompilerParams(
                dimension_semantics=("parallel",),
                vmem_limit_bytes=32 * 1024 * 1024),
        )(x, *operands)

    # Single slice back to the logical (B, out_features) result.
    return lax.slice(out_p, (0, 0), (B, out_features))


def init_params(key, input_size=784, lin1=256, lin2=256, lin3=256, out=10,
                dtype=jnp.float32):
    """nn.Linear-style uniform(-1/sqrt(fan_in), 1/sqrt(fan_in)) init.

    dtype=jnp.bfloat16 is the recommended weight dtype on ALL generations
    (v5e/v6e/v7x MXUs are bf16-native): it halves weight DMA and resident weight
    VMEM. Biases stay f32 and are added after f32 accumulation, so the bias-add /
    softshrink VPU math is f32 everywhere (v5e has no bf16 VPU anyway).
    Int8 weights would only be viable on v5e/v6e; v7x's MXU is fp8-only.
    """
    sizes = [(input_size, lin1), (lin1, lin2), (lin2, lin3), (lin3, out)]
    params = []
    for i, (fan_in, fan_out) in enumerate(sizes):
        kw, kb = jax.random.split(jax.random.fold_in(key, i))
        bound = 1.0 / jnp.sqrt(float(fan_in))
        w = jax.random.uniform(kw, (fan_in, fan_out), jnp.float32, -bound, bound)
        b = jax.random.uniform(kb, (fan_out,), jnp.float32, -bound, bound)
        params.append((w.astype(dtype), b))
    return params


def _reference(x, params):
    def softshrink(v, lambd=LAMBD):
        return jnp.where(v > lambd, v - lambd, jnp.where(v < -lambd, v + lambd, 0.0))

    h = x
    for i, (w, b) in enumerate(params):
        h = h @ w + b
        if i < len(params) - 1:
            h = softshrink(h)
    return h


if __name__ == "__main__":
    key = jax.random.PRNGKey(0)
    kx, kp = jax.random.split(key)

    input_size = 784
    fwd = jax.jit(softshrink_model)

    params = init_params(kp, input_size=input_size)

    # 1) Small batch: single-call, no-grid, fully VMEM-resident fused path (f32).
    x_small = jax.random.normal(kx, (8, input_size), jnp.float32)
    out = jax.block_until_ready(fwd(x_small, params))
    ref = _reference(x_small, params)
    assert out.shape == (8, 10), out.shape
    assert jnp.allclose(out, ref, atol=1e-4, rtol=1e-4), "f32 small-batch mismatch"

    # 2) Larger, non-multiple batch: exercises the ragged cdiv grid path
    #    (grid=2, last block partial, masked store).
    x_big = jax.random.normal(jax.random.fold_in(kx, 1), (1500, input_size), jnp.float32)
    out_big = jax.block_until_ready(fwd(x_big, params))
    ref_big = _reference(x_big, params)
    assert out_big.shape == (1500, 10), out_big.shape
    assert jnp.allclose(out_big, ref_big, atol=1e-4, rtol=1e-4), "f32 big-batch mismatch"

    # 3) bf16 weights (recommended on all generations): bf16 MXU feed, f32 softshrink.
    params_bf16 = init_params(kp, input_size=input_size, dtype=jnp.bfloat16)
    out_bf16 = jax.block_until_ready(fwd(x_small, params_bf16))
    ref_bf16 = _reference(x_small, params_bf16)
    assert jnp.allclose(out_bf16, ref_bf16, atol=5e-2, rtol=5e-2), "bf16 mismatch"

    print("KERNEL_OK")
</pallas_src>

<mosaic_0001>
module attributes {stable_mosaic.version = 11 : i64} {
  func.func @_fused_mlp_kernel(%arg0: memref<8x784xf32, #tpu.memory_space<vmem>>, %arg1: memref<784x256xf32, #tpu.memory_space<vmem>>, %arg2: memref<1x256xf32, #tpu.memory_space<vmem>>, %arg3: memref<256x256xf32, #tpu.memory_space<vmem>>, %arg4: memref<1x256xf32, #tpu.memory_space<vmem>>, %arg5: memref<256x256xf32, #tpu.memory_space<vmem>>, %arg6: memref<1x256xf32, #tpu.memory_space<vmem>>, %arg7: memref<256x128xf32, #tpu.memory_space<vmem>>, %arg8: memref<1x128xf32, #tpu.memory_space<vmem>>, %arg9: memref<8x128xf32, #tpu.memory_space<vmem>>) attributes {dimension_semantics = [], scalar_prefetch = 0 : i64, scratch_operands = 0 : i64, tpu.core_type = #tpu.core_type<tc>} {
    %c0 = arith.constant 0 : index
    %c0_0 = arith.constant 0 : index
    %0 = vector.load %arg0[%c0, %c0_0] : memref<8x784xf32, #tpu.memory_space<vmem>>, vector<8x784xf32>
    %c0_1 = arith.constant 0 : index
    %c0_2 = arith.constant 0 : index
    %1 = vector.load %arg1[%c0_1, %c0_2] : memref<784x256xf32, #tpu.memory_space<vmem>>, vector<784x256xf32>
    %cst = arith.constant dense<0.000000e+00> : vector<8x256xf32>
    %2 = tpu.matmul %0, %1, %cst {dimension_numbers = #tpu.dot_dimension_numbers<[1], [0], [0], [1], [0, 0, 1, 1], [], []>} : vector<8x784xf32>, vector<784x256xf32>, vector<8x256xf32> -> vector<8x256xf32>
    %c0_3 = arith.constant 0 : index
    %c0_4 = arith.constant 0 : index
    %3 = vector.load %arg2[%c0_3, %c0_4] : memref<1x256xf32, #tpu.memory_space<vmem>>, vector<1x256xf32>
    %4 = vector.broadcast %3 : vector<1x256xf32> to vector<8x256xf32>
    %5 = arith.addf %2, %4 : vector<8x256xf32>
    %cst_5 = arith.constant 5.000000e-01 : f32
    %6 = vector.broadcast %cst_5 : f32 to vector<8x256xf32>
    %7 = arith.cmpf ogt, %5, %6 : vector<8x256xf32>
    %cst_6 = arith.constant 5.000000e-01 : f32
    %8 = vector.broadcast %cst_6 : f32 to vector<8x256xf32>
    %9 = arith.subf %5, %8 : vector<8x256xf32>
    %cst_7 = arith.constant -5.000000e-01 : f32
    %10 = vector.broadcast %cst_7 : f32 to vector<8x256xf32>
    %11 = arith.cmpf olt, %5, %10 : vector<8x256xf32>
    %cst_8 = arith.constant 5.000000e-01 : f32
    %12 = vector.broadcast %cst_8 : f32 to vector<8x256xf32>
    %13 = arith.addf %5, %12 : vector<8x256xf32>
    %cst_9 = arith.constant 0.000000e+00 : f32
    %14 = vector.broadcast %cst_9 : f32 to vector<8x256xf32>
    %15 = arith.select %11, %13, %14 : vector<8x256xi1>, vector<8x256xf32>
    %16 = arith.select %7, %9, %15 : vector<8x256xi1>, vector<8x256xf32>
    %c0_10 = arith.constant 0 : index
    %c0_11 = arith.constant 0 : index
    %17 = vector.load %arg3[%c0_10, %c0_11] : memref<256x256xf32, #tpu.memory_space<vmem>>, vector<256x256xf32>
    %cst_12 = arith.constant dense<0.000000e+00> : vector<8x256xf32>
    %18 = tpu.matmul %16, %17, %cst_12 {dimension_numbers = #tpu.dot_dimension_numbers<[1], [0], [0], [1], [0, 0, 1, 1], [], []>} : vector<8x256xf32>, vector<256x256xf32>, vector<8x256xf32> -> vector<8x256xf32>
    %c0_13 = arith.constant 0 : index
    %c0_14 = arith.constant 0 : index
    %19 = vector.load %arg4[%c0_13, %c0_14] : memref<1x256xf32, #tpu.memory_space<vmem>>, vector<1x256xf32>
    %20 = vector.broadcast %19 : vector<1x256xf32> to vector<8x256xf32>
    %21 = arith.addf %18, %20 : vector<8x256xf32>
    %cst_15 = arith.constant 5.000000e-01 : f32
    %22 = vector.broadcast %cst_15 : f32 to vector<8x256xf32>
    %23 = arith.cmpf ogt, %21, %22 : vector<8x256xf32>
    %cst_16 = arith.constant 5.000000e-01 : f32
    %24 = vector.broadcast %cst_16 : f32 to vector<8x256xf32>
    %25 = arith.subf %21, %24 : vector<8x256xf32>
    %cst_17 = arith.constant -5.000000e-01 : f32
    %26 = vector.broadcast %cst_17 : f32 to vector<8x256xf32>
    %27 = arith.cmpf olt, %21, %26 : vector<8x256xf32>
    %cst_18 = arith.constant 5.000000e-01 : f32
    %28 = vector.broadcast %cst_18 : f32 to vector<8x256xf32>
    %29 = arith.addf %21, %28 : vector<8x256xf32>
    %cst_19 = arith.constant 0.000000e+00 : f32
    %30 = vector.broadcast %cst_19 : f32 to vector<8x256xf32>
    %31 = arith.select %27, %29, %30 : vector<8x256xi1>, vector<8x256xf32>
    %32 = arith.select %23, %25, %31 : vector<8x256xi1>, vector<8x256xf32>
    %c0_20 = arith.constant 0 : index
    %c0_21 = arith.constant 0 : index
    %33 = vector.load %arg5[%c0_20, %c0_21] : memref<256x256xf32, #tpu.memory_space<vmem>>, vector<256x256xf32>
    %cst_22 = arith.constant dense<0.000000e+00> : vector<8x256xf32>
    %34 = tpu.matmul %32, %33, %cst_22 {dimension_numbers = #tpu.dot_dimension_numbers<[1], [0], [0], [1], [0, 0, 1, 1], [], []>} : vector<8x256xf32>, vector<256x256xf32>, vector<8x256xf32> -> vector<8x256xf32>
    %c0_23 = arith.constant 0 : index
    %c0_24 = arith.constant 0 : index
    %35 = vector.load %arg6[%c0_23, %c0_24] : memref<1x256xf32, #tpu.memory_space<vmem>>, vector<1x256xf32>
    %36 = vector.broadcast %35 : vector<1x256xf32> to vector<8x256xf32>
    %37 = arith.addf %34, %36 : vector<8x256xf32>
    %cst_25 = arith.constant 5.000000e-01 : f32
    %38 = vector.broadcast %cst_25 : f32 to vector<8x256xf32>
    %39 = arith.cmpf ogt, %37, %38 : vector<8x256xf32>
    %cst_26 = arith.constant 5.000000e-01 : f32
    %40 = vector.broadcast %cst_26 : f32 to vector<8x256xf32>
    %41 = arith.subf %37, %40 : vector<8x256xf32>
    %cst_27 = arith.constant -5.000000e-01 : f32
    %42 = vector.broadcast %cst_27 : f32 to vector<8x256xf32>
    %43 = arith.cmpf olt, %37, %42 : vector<8x256xf32>
    %cst_28 = arith.constant 5.000000e-01 : f32
    %44 = vector.broadcast %cst_28 : f32 to vector<8x256xf32>
    %45 = arith.addf %37, %44 : vector<8x256xf32>
    %cst_29 = arith.constant 0.000000e+00 : f32
    %46 = vector.broadcast %cst_29 : f32 to vector<8x256xf32>
    %47 = arith.select %43, %45, %46 : vector<8x256xi1>, vector<8x256xf32>
    %48 = arith.select %39, %41, %47 : vector<8x256xi1>, vector<8x256xf32>
    %c0_30 = arith.constant 0 : index
    %c0_31 = arith.constant 0 : index
    %49 = vector.load %arg7[%c0_30, %c0_31] : memref<256x128xf32, #tpu.memory_space<vmem>>, vector<256x128xf32>
    %cst_32 = arith.constant dense<0.000000e+00> : vector<8x128xf32>
    %50 = tpu.matmul %48, %49, %cst_32 {dimension_numbers = #tpu.dot_dimension_numbers<[1], [0], [0], [1], [0, 0, 1, 1], [], []>} : vector<8x256xf32>, vector<256x128xf32>, vector<8x128xf32> -> vector<8x128xf32>
    %c0_33 = arith.constant 0 : index
    %c0_34 = arith.constant 0 : index
    %51 = vector.load %arg8[%c0_33, %c0_34] : memref<1x128xf32, #tpu.memory_space<vmem>>, vector<1x128xf32>
    %52 = vector.broadcast %51 : vector<1x128xf32> to vector<8x128xf32>
    %53 = arith.addf %50, %52 : vector<8x128xf32>
    %c0_35 = arith.constant 0 : index
    %c0_36 = arith.constant 0 : index
    %54 = vector.load %arg9[%c0_35, %c0_36] : memref<8x128xf32, #tpu.memory_space<vmem>>, vector<8x128xf32>
    tpu.vector_store %arg9[%c0_35, %c0_36], %53 {strides = array<i32>} : memref<8x128xf32, #tpu.memory_space<vmem>>, vector<8x128xf32>,
    return
  }
}

</mosaic_0001>

<bundles_post_ra>
// kernel: softshrink_model.1
= control target key start
LH: loop header
LB: loop body
LE: loop exit
PB: predicated region body
PF: predicated region fallthrough
CT: control target
= control target key end

     0   :  { %14 = vsyncpa [#allocation3], 0  ;;  %s1500_s0 = inlined_call_operand.vmem [shape: f32[8,784], index: 0, kind: input, shape index: {}]   ;;  %s1501_s1 = inlined_call_operand.hbm [shape: f32[784,256], index: 1, kind: input, shape index: {}]   ;;  %s1502_s2 = inlined_call_operand.vmem [shape: f32[1,256], index: 2, kind: input, shape index: {}]   ;;  %s1503_s3 = inlined_call_operand.vmem [shape: f32[256,256], index: 3, kind: input, shape index: {}]   ;;  %s1504_s4 = inlined_call_operand.vmem [shape: f32[1,256], index: 4, kind: input, shape index: {}]   ;;  %s1505_s5 = inlined_call_operand.hbm [shape: f32[256,256], index: 5, kind: input, shape index: {}]   ;;  %s1506_s6 = inlined_call_operand.vmem [shape: f32[1,256], index: 6, kind: input, shape index: {}]   ;;  %s1507_s7 = inlined_call_operand.vmem [shape: f32[256,128], index: 7, kind: input, shape index: {}]   ;;  %s1508_s8 = inlined_call_operand.vmem [shape: f32[1,128], index: 8, kind: input, shape index: {}]   ;;  %s1509_s9 = inlined_call_operand.hbm [shape: f32[8,128], index: 9, kind: output, shape index: {}]  }
   0x1   :  { %15 = vsyncpa [#allocation6], 0 }
   0x2   :  { %16 = vsyncpa [#allocation4], 0  ;;  %s23_s11 = sshll.u32 %s1501_s1, 4  ;;  %s1081_s12 = smov [#allocation2]   ;;  %s24_s11 = int_to_ptr.hbm [resolvable:$true] %s23_s11 }
   0x3   :  { %s25_s13 = sshll.u32 %s1081_s12, 4  ;;  %s42_s16 = sshll.u32 %s1505_s5, 4  ;;  %s26_s13 = int_to_ptr.vmem [resolvable:$true] %s25_s13  ;;  %s43_s16 = int_to_ptr.hbm [resolvable:$true] %s42_s16 }
   0x4   :  { %s1082_s17 = smov 256   ;;  %s1083_s18 = smov 16  }
   0x5   :  { %31 = dma.hbm_to_vmem [thread:$0]  %s24_s11, 25088, %s26_s13, [#allocation3], %s1082_s17, %s1082_s17, %s1083_s18  }
   0x6   :  { %s1084_s19 = smov [#allocation5]  }
   0x7   :  { %s44_s20 = sshll.u32 %s1084_s19, 4  ;;  %s45_s20 = int_to_ptr.vmem [resolvable:$true] %s44_s20 }
   0x8   :  { %50 = dma.hbm_to_vmem [thread:$0]  %s43_s16, 8192, %s45_s20, [#allocation6], %s1082_s17, %s1082_s17, %s1083_s18  }
   0x9   :  { %1075 = dma.done.wait [#allocation3], 25088  }
   0xa   :  { %1076 = vsyncadd [#allocation3], 4294942208 }
   0xb   :  { %1077 = dma.done.wait [#allocation6], 8192  }
   0xc   :  { %1078 = vsyncadd [#allocation6], 4294959104  ;;  %v102_v0 = vld [vmem:[#allocation2 + $0xf0] sm:$0xff]  ;;  %v100_v3 = vld [vmem:[#allocation2 + $0xe0] sm:$0xff]  ;;  %vm274_vm0 = vcmask 130048   ;;  %s1085_s29 = smov [#allocation7]  }
   0xd   :  { %v166_v1 = vld [vmem:[#allocation2 + $0x2f0] sm:$0xff]  ;;  %278 = vmatpush.msra.mxu0 %v102_v0  ;;  %v164_v5 = vld [vmem:[#allocation2 + $0x2e0] sm:$0xff]  ;;  %s976_s30 = sshll.u32 %s1085_s29, 4  ;;  %s977_s30 = int_to_ptr.vmem [resolvable:$true] %s976_s30 }
   0xe   :  { %v198_v2 = vld [vmem:[#allocation2 + $0x3f0] sm:$0xff]  ;;  %318 = vmatpush.msra.mxu2 %v166_v1  ;;  %v196_v6 = vld [vmem:[#allocation2 + $0x3e0] sm:$0xff] }
   0xf   :  { %v134_v4 = vld [vmem:[#allocation2 + $0x1f0] sm:$0xff]  ;;  %338 = vmatpush.msra.mxu3 %v198_v2  ;;  %v132_v8 = vld [vmem:[#allocation2 + $0x1e0] sm:$0xff]  ;;  %279 = vmatpush.msra.mxu0 %v100_v3  ;;  %v103_v2 = vld [vmem:[#allocation2 + $0xf8] sm:$0xff] }
  0x10   :  { %298 = vmatpush.msra.mxu1 %v134_v4  ;;  %v98_v7 = vld [vmem:[#allocation2 + $0xd0] sm:$0xff]  ;;  %319 = vmatpush.msra.mxu2 %v164_v5  ;;  %v96_v11 = vld [vmem:[#allocation2 + $0xc0] sm:$0xff] }
  0x11   :  { %v162_v9 = vld [vmem:[#allocation2 + $0x2d0] sm:$0xff]  ;;  %339 = vmatpush.msra.mxu3 %v196_v6  ;;  %v160_v13 = vld [vmem:[#allocation2 + $0x2c0] sm:$0xff]  ;;  %280 = vmatpush.msra.mxu0 %v98_v7  ;;  %v101_v7 = vld [vmem:[#allocation2 + $0xe8] sm:$0xff] }
  0x12   :  { %v194_v10 = vld [vmem:[#allocation2 + $0x3d0] sm:$0xff]  ;;  %299 = vmatpush.msra.mxu1 %v132_v8  ;;  %320 = vmatpush.msra.mxu2 %v162_v9  ;;  %v192_v14 = vld [vmem:[#allocation2 + $0x3c0] sm:$0xff]  ;;  %v135_v8 = vld [vmem:[#allocation2 + $0x1f8] sm:$0xff] }
  0x13   :  { %v130_v12 = vld [vmem:[#allocation2 + $0x1d0] sm:$0xff]  ;;  %v128_v15 = vld [vmem:[#allocation2 + $0x1c0] sm:$0xff]  ;;  %340 = vmatpush.msra.mxu3 %v194_v10  ;;  %281 = vmatpush.msra.mxu0 %v96_v11 }
  0x14   :  { %300 = vmatpush.msra.mxu1 %v130_v12  ;;  %v94_v16 = vld [vmem:[#allocation2 + $0xb0] sm:$0xff]  ;;  %321 = vmatpush.msra.mxu2 %v160_v13  ;;  %v92_v20 = vld [vmem:[#allocation2 + $0xa0] sm:$0xff]  ;;  %v1156_v12 = vld [vmem:[%s1500_s0 + $0x18] sm:$0xff] }
  0x15   :  { %v158_v17 = vld [vmem:[#allocation2 + $0x2b0] sm:$0xff]  ;;  %341 = vmatpush.msra.mxu3 %v192_v14  ;;  %v156_v21 = vld [vmem:[#allocation2 + $0x2a0] sm:$0xff]  ;;  %282 = vmatpush.msra.mxu0 %v94_v16  ;;  %v133_v13 = vld [vmem:[#allocation2 + $0x1e8] sm:$0xff] }
  0x16   :  { %v190_v18 = vld [vmem:[#allocation2 + $0x3b0] sm:$0xff]  ;;  %301 = vmatpush.msra.mxu1 %v128_v15  ;;  %322 = vmatpush.msra.mxu2 %v158_v17  ;;  %v188_v22 = vld [vmem:[#allocation2 + $0x3a0] sm:$0xff]  ;;  %v99_v14 = vld [vmem:[#allocation2 + $0xd8] sm:$0xff] }
  0x17   :  { %v126_v19 = vld [vmem:[#allocation2 + $0x1b0] sm:$0xff]  ;;  %v124_v23 = vld [vmem:[#allocation2 + $0x1a0] sm:$0xff]  ;;  %342 = vmatpush.msra.mxu3 %v190_v18  ;;  %283 = vmatpush.msra.mxu0 %v92_v20  ;;  %v131_v17 = vld [vmem:[#allocation2 + $0x1d8] sm:$0xff] }
  0x18   :  { %302 = vmatpush.msra.mxu1 %v126_v19  ;;  %v90_v24 = vld [vmem:[#allocation2 + $0x90] sm:$0xff]  ;;  %323 = vmatpush.msra.mxu2 %v156_v21  ;;  %v88_v28 = vld [vmem:[#allocation2 + $0x80] sm:$0xff]  ;;  %v1163_v18 = vld [vmem:[%s1500_s0 + $0x8] sm:$0xff] }
  0x19   :  { %v154_v25 = vld [vmem:[#allocation2 + $0x290] sm:$0xff]  ;;  %343 = vmatpush.msra.mxu3 %v188_v22  ;;  %v152_v29 = vld [vmem:[#allocation2 + $0x280] sm:$0xff]  ;;  %284 = vmatpush.msra.mxu0 %v90_v24  ;;  %v97_v19 = vld [vmem:[#allocation2 + $0xc8] sm:$0xff] }
  0x1a   :  { %v186_v26 = vld [vmem:[#allocation2 + $0x390] sm:$0xff]  ;;  %303 = vmatpush.msra.mxu1 %v124_v23  ;;  %324 = vmatpush.msra.mxu2 %v154_v25  ;;  %v184_v30 = vld [vmem:[#allocation2 + $0x380] sm:$0xff]  ;;  %v95_v22 = vld [vmem:[#allocation2 + $0xb8] sm:$0xff] }
  0x1b   :  { %v122_v27 = vld [vmem:[#allocation2 + $0x190] sm:$0xff]  ;;  %v120_v31 = vld [vmem:[#allocation2 + $0x180] sm:$0xff]  ;;  %344 = vmatpush.msra.mxu3 %v186_v26  ;;  %285 = vmatpush.msra.mxu0 %v88_v28  ;;  %v129_v23 = vld [vmem:[#allocation2 + $0x1c8] sm:$0xff] }
  0x1c   :  { %304 = vmatpush.msra.mxu1 %v122_v27  ;;  %v86_v32 = vld [vmem:[#allocation2 + $0x70] sm:$0xff]  ;;  %325 = vmatpush.msra.mxu2 %v152_v29  ;;  %v84_v36 = vld [vmem:[#allocation2 + $0x60] sm:$0xff]  ;;  %v93_v26 = vld [vmem:[#allocation2 + $0xa8] sm:$0xff] }
  0x1d   :  { %v150_v33 = vld [vmem:[#allocation2 + $0x270] sm:$0xff]  ;;  %345 = vmatpush.msra.mxu3 %v184_v30  ;;  %v148_v37 = vld [vmem:[#allocation2 + $0x260] sm:$0xff]  ;;  %286 = vmatpush.msra.mxu0 %v86_v32  ;;  %v127_v27 = vld [vmem:[#allocation2 + $0x1b8] sm:$0xff] }
  0x1e   :  { %v182_v34 = vld [vmem:[#allocation2 + $0x370] sm:$0xff]  ;;  %305 = vmatpush.msra.mxu1 %v120_v31  ;;  %326 = vmatpush.msra.mxu2 %v150_v33  ;;  %v180_v38 = vld [vmem:[#allocation2 + $0x360] sm:$0xff]  ;;  %v91_v30 = vld [vmem:[#allocation2 + $0x98] sm:$0xff] }
  0x1f   :  { %v118_v35 = vld [vmem:[#allocation2 + $0x170] sm:$0xff]  ;;  %v116_v39 = vld [vmem:[#allocation2 + $0x160] sm:$0xff]  ;;  %346 = vmatpush.msra.mxu3 %v182_v34  ;;  %287 = vmatpush.msra.mxu0 %v84_v36  ;;  %v125_v31 = vld [vmem:[#allocation2 + $0x1a8] sm:$0xff] }
  0x20   :  { %306 = vmatpush.msra.mxu1 %v118_v35  ;;  %v82_v40 = vld [vmem:[#allocation2 + $0x50] sm:$0xff]  ;;  %327 = vmatpush.msra.mxu2 %v148_v37  ;;  %v80_v44 = vld [vmem:[#allocation2 + $0x40] sm:$0xff]  ;;  %v89_v34 = vld [vmem:[#allocation2 + $0x88] sm:$0xff] }
  0x21   :  { %v146_v41 = vld [vmem:[#allocation2 + $0x250] sm:$0xff]  ;;  %347 = vmatpush.msra.mxu3 %v180_v38  ;;  %v144_v45 = vld [vmem:[#allocation2 + $0x240] sm:$0xff]  ;;  %288 = vmatpush.msra.mxu0 %v82_v40  ;;  %v123_v35 = vld [vmem:[#allocation2 + $0x198] sm:$0xff] }
  0x22   :  { %v178_v42 = vld [vmem:[#allocation2 + $0x350] sm:$0xff]  ;;  %307 = vmatpush.msra.mxu1 %v116_v39  ;;  %328 = vmatpush.msra.mxu2 %v146_v41  ;;  %v176_v46 = vld [vmem:[#allocation2 + $0x340] sm:$0xff]  ;;  %v87_v38 = vld [vmem:[#allocation2 + $0x78] sm:$0xff] }
  0x23   :  { %v114_v43 = vld [vmem:[#allocation2 + $0x150] sm:$0xff]  ;;  %v112_v47 = vld [vmem:[#allocation2 + $0x140] sm:$0xff]  ;;  %348 = vmatpush.msra.mxu3 %v178_v42  ;;  %289 = vmatpush.msra.mxu0 %v80_v44  ;;  %v121_v39 = vld [vmem:[#allocation2 + $0x188] sm:$0xff] }
  0x24   :  { %308 = vmatpush.msra.mxu1 %v114_v43  ;;  %v78_v48 = vld [vmem:[#allocation2 + $0x30] sm:$0xff]  ;;  %329 = vmatpush.msra.mxu2 %v144_v45  ;;  %v76_v52 = vld [vmem:[#allocation2 + $0x20] sm:$0xff]  ;;  %v85_v42 = vld [vmem:[#allocation2 + $0x68] sm:$0xff] }
  0x25   :  { %v142_v49 = vld [vmem:[#allocation2 + $0x230] sm:$0xff]  ;;  %349 = vmatpush.msra.mxu3 %v176_v46  ;;  %v140_v53 = vld [vmem:[#allocation2 + $0x220] sm:$0xff]  ;;  %290 = vmatpush.msra.mxu0 %v78_v48  ;;  %v119_v43 = vld [vmem:[#allocation2 + $0x178] sm:$0xff] }
  0x26   :  { %v174_v50 = vld [vmem:[#allocation2 + $0x330] sm:$0xff]  ;;  %309 = vmatpush.msra.mxu1 %v112_v47  ;;  %330 = vmatpush.msra.mxu2 %v142_v49  ;;  %v172_v54 = vld [vmem:[#allocation2 + $0x320] sm:$0xff]  ;;  %v83_v46 = vld [vmem:[#allocation2 + $0x58] sm:$0xff] }
  0x27   :  { %v110_v51 = vld [vmem:[#allocation2 + $0x130] sm:$0xff]  ;;  %v108_v55 = vld [vmem:[#allocation2 + $0x120] sm:$0xff]  ;;  %350 = vmatpush.msra.mxu3 %v174_v50  ;;  %291 = vmatpush.msra.mxu0 %v76_v52  ;;  %v117_v47 = vld [vmem:[#allocation2 + $0x168] sm:$0xff] }
  0x28   :  { %310 = vmatpush.msra.mxu1 %v110_v51  ;;  %v74_v56 = vld [vmem:[#allocation2 + $0x10] sm:$0xff]  ;;  %331 = vmatpush.msra.mxu2 %v140_v53  ;;  %v72_v60 = vld [vmem:[#allocation2] sm:$0xff]  ;;  %v81_v50 = vld [vmem:[#allocation2 + $0x48] sm:$0xff] }
  0x29   :  { %v138_v57 = vld [vmem:[#allocation2 + $0x210] sm:$0xff]  ;;  %351 = vmatpush.msra.mxu3 %v172_v54  ;;  %v136_v61 = vld [vmem:[#allocation2 + $0x200] sm:$0xff]  ;;  %292 = vmatpush.msra.mxu0 %v74_v56  ;;  %v115_v51 = vld [vmem:[#allocation2 + $0x158] sm:$0xff] }
  0x2a   :  { %v170_v58 = vld [vmem:[#allocation2 + $0x310] sm:$0xff]  ;;  %311 = vmatpush.msra.mxu1 %v108_v55  ;;  %332 = vmatpush.msra.mxu2 %v138_v57  ;;  %v168_v62 = vld [vmem:[#allocation2 + $0x300] sm:$0xff]  ;;  %v79_v54 = vld [vmem:[#allocation2 + $0x38] sm:$0xff] }
  0x2b   :  { %v106_v59 = vld [vmem:[#allocation2 + $0x110] sm:$0xff]  ;;  %352 = vmatpush.msra.mxu3 %v170_v58  ;;  %v104_v1 = vld [vmem:[#allocation2 + $0x100] sm:$0xff]  ;;  %293 = vmatpush.msra.mxu0 %v72_v60  ;;  %v113_v55 = vld [vmem:[#allocation2 + $0x148] sm:$0xff] }
  0x2c   :  { %v230_v63 = vld [vmem:[#allocation2 + $0x4f0] sm:$0xff]  ;;  %312 = vmatpush.msra.mxu1 %v106_v59  ;;  %333 = vmatpush.msra.mxu2 %v136_v61  ;;  %v228_v3 = vld [vmem:[#allocation2 + $0x4e0] sm:$0xff]  ;;  %v77_v58 = vld [vmem:[#allocation2 + $0x28] sm:$0xff] }
  0x2d   :  { %v266_v0 = vld [vmem:[#allocation2 + $0x610] sm:$0xff]  ;;  %353 = vmatpush.msra.mxu3 %v168_v62  ;;  %358 = vmatpush.msrb.mxu0 %v230_v63  ;;  %v264_v5 = vld [vmem:[#allocation2 + $0x600] sm:$0xff]  ;;  %v111_v59 = vld [vmem:[#allocation2 + $0x138] sm:$0xff] }
  0x2e   :  { %v262_v4 = vld [vmem:[#allocation2 + $0x5f0] sm:$0xff]  ;;  %412 = vmatpush.msrb.mxu2 %v266_v0  ;;  %313 = vmatpush.msra.mxu1 %v104_v1  ;;  %v260_v10 = vld [vmem:[#allocation2 + $0x5e0] sm:$0xff]  ;;  %v75_v63 = vld [vmem:[#allocation2 + $0x18] sm:$0xff] }
  0x2f   :  { %v1145_v6 = vld [vmem:[%s1500_s0 + $0x10] sm:$0xff]  ;;  %418 = vmatpush.msrb.mxu3 %v103_v2  ;;  %359 = vmatpush.msrb.mxu0 %v228_v3  ;;  %v1150_v11 = vld [vmem:[%s1500_s0] sm:$0xff]  ;;  %v109_v0 = vld [vmem:[#allocation2 + $0x128] sm:$0xff] }
  0x30   :  { %v226_v9 = vld [vmem:[#allocation2 + $0x4d0] sm:$0xff]  ;;  %378 = vmatpush.msrb.mxu1 %v262_v4  ;;  %413 = vmatpush.msrb.mxu2 %v264_v5  ;;  %v224_v15 = vld [vmem:[#allocation2 + $0x4c0] sm:$0xff]  ;;  %v73_v4 = vld [vmem:[#allocation2 + $0x8] sm:$0xff] }
  0x31   :  { %334 = vmatmul.f32.vlgmr.msra.gmra.mxu2 %v1145_v6  ;;  %419 = vmatpush.msrb.mxu3 %v101_v7  ;;  %v258_v16 = vld [vmem:[#allocation2 + $0x5d0] sm:$0xff]  ;;  %v256_v21 = vld [vmem:[#allocation2 + $0x5c0] sm:$0xff]  ;;  %v107_v5 = vld [vmem:[#allocation2 + $0x118] sm:$0xff] }
  0x32   :  { %438 = vmatpush.msra.mxu2 %v135_v8  ;;  %360 = vmatpush.msrb.mxu0 %v226_v9  ;;  %v222_v20 = vld [vmem:[#allocation2 + $0x4b0] sm:$0xff]  ;;  %v220_v24 = vld [vmem:[#allocation2 + $0x4a0] sm:$0xff]  ;;  %v231_v8 = vld [vmem:[#allocation2 + $0x4f8] sm:$0xff] }
  0x33   :  { %379 = vmatpush.msrb.mxu1 %v260_v10  ;;  %294 = vmatmul.f32.vlgmr.msra.gmra.mxu0 %v1150_v11  ;;  %v254_v25 = vld [vmem:[#allocation2 + $0x5b0] sm:$0xff]  ;;  %v252_v29 = vld [vmem:[#allocation2 + $0x5a0] sm:$0xff]  ;;  %v1182_v9 = vld [vmem:[%s1500_s0 + $0x28] sm:$0xff] }
  0x34   :  { %354 = vmatmul.f32.vlgmr.msra.gmra.mxu3 %v1156_v12  ;;  %439 = vmatpush.msra.mxu2 %v133_v13  ;;  %v218_v28 = vld [vmem:[#allocation2 + $0x490] sm:$0xff]  ;;  %v216_v32 = vld [vmem:[#allocation2 + $0x480] sm:$0xff]  ;;  %v105_v10 = vld [vmem:[#allocation2 + $0x108] sm:$0xff] }
  0x35   :  { %420 = vmatpush.msrb.mxu3 %v99_v14  ;;  %361 = vmatpush.msrb.mxu0 %v224_v15  ;;  %v250_v33 = vld [vmem:[#allocation2 + $0x590] sm:$0xff]  ;;  %v248_v37 = vld [vmem:[#allocation2 + $0x580] sm:$0xff]  ;;  %v167_v13 = vld [vmem:[#allocation2 + $0x2f8] sm:$0xff] }
  0x36   :  { %380 = vmatpush.msrb.mxu1 %v258_v16  ;;  %440 = vmatpush.msra.mxu2 %v131_v17  ;;  %v214_v36 = vld [vmem:[#allocation2 + $0x470] sm:$0xff]  ;;  %v212_v40 = vld [vmem:[#allocation2 + $0x460] sm:$0xff]  ;;  %v229_v14 = vld [vmem:[#allocation2 + $0x4e8] sm:$0xff] }
  0x37   :  { %314 = vmatmul.f32.vlgmr.msra.gmra.mxu1 %v1163_v18  ;;  %421 = vmatpush.msrb.mxu3 %v97_v19  ;;  %v246_v41 = vld [vmem:[#allocation2 + $0x570] sm:$0xff]  ;;  %v244_v45 = vld [vmem:[#allocation2 + $0x560] sm:$0xff]  ;;  %v263_v15 = vld [vmem:[#allocation2 + $0x5f8] sm:$0xff] }
  0x38   :  { %362 = vmatpush.msrb.mxu0 %v222_v20  ;;  %381 = vmatpush.msrb.mxu1 %v256_v21  ;;  %v210_v44 = vld [vmem:[#allocation2 + $0x450] sm:$0xff]  ;;  %v208_v48 = vld [vmem:[#allocation2 + $0x440] sm:$0xff]  ;;  %v199_v16 = vld [vmem:[#allocation2 + $0x3f8] sm:$0xff] }
  0x39   :  { %422 = vmatpush.msrb.mxu3 %v95_v22  ;;  %441 = vmatpush.msra.mxu2 %v129_v23  ;;  %v242_v49 = vld [vmem:[#allocation2 + $0x550] sm:$0xff]  ;;  %v240_v53 = vld [vmem:[#allocation2 + $0x540] sm:$0xff]  ;;  %v165_v17 = vld [vmem:[#allocation2 + $0x2e8] sm:$0xff] }
  0x3a   :  { %363 = vmatpush.msrb.mxu0 %v220_v24  ;;  %382 = vmatpush.msrb.mxu1 %v254_v25  ;;  %v206_v52 = vld [vmem:[#allocation2 + $0x430] sm:$0xff]  ;;  %v204_v56 = vld [vmem:[#allocation2 + $0x420] sm:$0xff]  ;;  %v227_v19 = vld [vmem:[#allocation2 + $0x4d8] sm:$0xff] }
  0x3b   :  { %423 = vmatpush.msrb.mxu3 %v93_v26  ;;  %442 = vmatpush.msra.mxu2 %v127_v27  ;;  %v238_v57 = vld [vmem:[#allocation2 + $0x530] sm:$0xff]  ;;  %v236_v61 = vld [vmem:[#allocation2 + $0x520] sm:$0xff]  ;;  %v261_v20 = vld [vmem:[#allocation2 + $0x5e8] sm:$0xff] }
  0x3c   :  { %364 = vmatpush.msrb.mxu0 %v218_v28  ;;  %383 = vmatpush.msrb.mxu1 %v252_v29  ;;  %v202_v60 = vld [vmem:[#allocation2 + $0x410] sm:$0xff]  ;;  %v200_v1 = vld [vmem:[#allocation2 + $0x400] sm:$0xff]  ;;  %v197_v21 = vld [vmem:[#allocation2 + $0x3e8] sm:$0xff] }
  0x3d   :  { %424 = vmatpush.msrb.mxu3 %v91_v30  ;;  %443 = vmatpush.msra.mxu2 %v125_v31  ;;  %v1169_v62 = vld [vmem:[%s1500_s0 + $0x30] sm:$0xff]  ;;  %v1174_v3 = vld [vmem:[%s1500_s0 + $0x20] sm:$0xff]  ;;  %v163_v22 = vld [vmem:[#allocation2 + $0x2d8] sm:$0xff]  ;;  %s978_s0 = sshll.u32 %s1509_s9, 4  ;;  %s979_s0 = int_to_ptr.hbm [resolvable:$true] %s978_s0 }
  0x3e   :  { %365 = vmatpush.msrb.mxu0 %v216_v32  ;;  %384 = vmatpush.msrb.mxu1 %v250_v33  ;;  %v234_v2 = vld [vmem:[#allocation2 + $0x510] sm:$0xff]  ;;  %v232_v7 = vld [vmem:[#allocation2 + $0x500] sm:$0xff]  ;;  %v225_v23 = vld [vmem:[#allocation2 + $0x4c8] sm:$0xff] }
  0x3f   :  { %425 = vmatpush.msrb.mxu3 %v89_v34  ;;  %444 = vmatpush.msra.mxu2 %v123_v35  ;;  %v259_v24 = vld [vmem:[#allocation2 + $0x5d8] sm:$0xff]  ;;  %v161_v26 = vld [vmem:[#allocation2 + $0x2c8] sm:$0xff] }
  0x40   :  { %366 = vmatpush.msrb.mxu0 %v214_v36  ;;  %385 = vmatpush.msrb.mxu1 %v248_v37  ;;  %v195_v25 = vld [vmem:[#allocation2 + $0x3d8] sm:$0xff]  ;;  %v257_v28 = vld [vmem:[#allocation2 + $0x5c8] sm:$0xff] }
  0x41   :  { %426 = vmatpush.msrb.mxu3 %v87_v38  ;;  %445 = vmatpush.msra.mxu2 %v121_v39  ;;  %v223_v27 = vld [vmem:[#allocation2 + $0x4b8] sm:$0xff]  ;;  %v193_v29 = vld [vmem:[#allocation2 + $0x3c8] sm:$0xff] }
  0x42   :  { %367 = vmatpush.msrb.mxu0 %v212_v40  ;;  %386 = vmatpush.msrb.mxu1 %v246_v41  ;;  %v159_v30 = vld [vmem:[#allocation2 + $0x2b8] sm:$0xff]  ;;  %v221_v31 = vld [vmem:[#allocation2 + $0x4a8] sm:$0xff] }
  0x43   :  { %427 = vmatpush.msrb.mxu3 %v85_v42  ;;  %446 = vmatpush.msra.mxu2 %v119_v43  ;;  %v255_v32 = vld [vmem:[#allocation2 + $0x5b8] sm:$0xff]  ;;  %v157_v34 = vld [vmem:[#allocation2 + $0x2a8] sm:$0xff] }
  0x44   :  { %368 = vmatpush.msrb.mxu0 %v210_v44  ;;  %387 = vmatpush.msrb.mxu1 %v244_v45  ;;  %v191_v33 = vld [vmem:[#allocation2 + $0x3b8] sm:$0xff]  ;;  %v253_v36 = vld [vmem:[#allocation2 + $0x5a8] sm:$0xff] }
  0x45   :  { %428 = vmatpush.msrb.mxu3 %v83_v46  ;;  %447 = vmatpush.msra.mxu2 %v117_v47  ;;  %v219_v35 = vld [vmem:[#allocation2 + $0x498] sm:$0xff]  ;;  %v189_v37 = vld [vmem:[#allocation2 + $0x3a8] sm:$0xff] }
  0x46   :  { %369 = vmatpush.msrb.mxu0 %v208_v48  ;;  %388 = vmatpush.msrb.mxu1 %v242_v49  ;;  %v155_v38 = vld [vmem:[#allocation2 + $0x298] sm:$0xff]  ;;  %v217_v39 = vld [vmem:[#allocation2 + $0x488] sm:$0xff] }
  0x47   :  { %429 = vmatpush.msrb.mxu3 %v81_v50  ;;  %448 = vmatpush.msra.mxu2 %v115_v51  ;;  %v251_v40 = vld [vmem:[#allocation2 + $0x598] sm:$0xff]  ;;  %v153_v42 = vld [vmem:[#allocation2 + $0x288] sm:$0xff] }
  0x48   :  { %370 = vmatpush.msrb.mxu0 %v206_v52  ;;  %389 = vmatpush.msrb.mxu1 %v240_v53  ;;  %v187_v41 = vld [vmem:[#allocation2 + $0x398] sm:$0xff]  ;;  %v249_v44 = vld [vmem:[#allocation2 + $0x588] sm:$0xff] }
  0x49   :  { %430 = vmatpush.msrb.mxu3 %v79_v54  ;;  %449 = vmatpush.msra.mxu2 %v113_v55  ;;  %v215_v43 = vld [vmem:[#allocation2 + $0x478] sm:$0xff]  ;;  %v185_v45 = vld [vmem:[#allocation2 + $0x388] sm:$0xff] }
  0x4a   :  { %371 = vmatpush.msrb.mxu0 %v204_v56  ;;  %390 = vmatpush.msrb.mxu1 %v238_v57  ;;  %v151_v46 = vld [vmem:[#allocation2 + $0x278] sm:$0xff]  ;;  %v213_v47 = vld [vmem:[#allocation2 + $0x468] sm:$0xff] }
  0x4b   :  { %431 = vmatpush.msrb.mxu3 %v77_v58  ;;  %450 = vmatpush.msra.mxu2 %v111_v59  ;;  %v247_v48 = vld [vmem:[#allocation2 + $0x578] sm:$0xff]  ;;  %v149_v50 = vld [vmem:[#allocation2 + $0x268] sm:$0xff] }
  0x4c   :  { %372 = vmatpush.msrb.mxu0 %v202_v60  ;;  %391 = vmatpush.msrb.mxu1 %v236_v61  ;;  %v183_v49 = vld [vmem:[#allocation2 + $0x378] sm:$0xff]  ;;  %v245_v52 = vld [vmem:[#allocation2 + $0x568] sm:$0xff] }
  0x4d   :  { %989 = vmatmul.msk.f32.vlgmr.msrb.gmra.mxu2 %vm274_vm0, %v1169_v62  ;;  %432 = vmatpush.msrb.mxu3 %v75_v63  ;;  %v211_v51 = vld [vmem:[#allocation2 + $0x458] sm:$0xff]  ;;  %v181_v53 = vld [vmem:[#allocation2 + $0x368] sm:$0xff] }
  0x4e   :  { %451 = vmatpush.msra.mxu2 %v109_v0  ;;  %373 = vmatpush.msrb.mxu0 %v200_v1  ;;  %v147_v54 = vld [vmem:[#allocation2 + $0x258] sm:$0xff]  ;;  %v209_v55 = vld [vmem:[#allocation2 + $0x448] sm:$0xff] }
  0x4f   :  { %392 = vmatpush.msrb.mxu1 %v234_v2  ;;  %374 = vmatmul.f32.vlgmr.msrb.gmra.mxu0 %v1174_v3  ;;  %v243_v56 = vld [vmem:[#allocation2 + $0x558] sm:$0xff]  ;;  %v145_v57 = vld [vmem:[#allocation2 + $0x248] sm:$0xff] }
  0x50   :  { %433 = vmatpush.msrb.mxu3 %v73_v4  ;;  %452 = vmatpush.msra.mxu2 %v107_v5  ;;  %v179_v58 = vld [vmem:[#allocation2 + $0x358] sm:$0xff]  ;;  %v241_v60 = vld [vmem:[#allocation2 + $0x548] sm:$0xff] }
  0x51   :  { %393 = vmatpush.msrb.mxu1 %v232_v7  ;;  %458 = vmatpush.msra.mxu0 %v167_v13  ;;  %v207_v59 = vld [vmem:[#allocation2 + $0x438] sm:$0xff]  ;;  %v177_v63 = vld [vmem:[#allocation2 + $0x348] sm:$0xff] }
  0x52   :  { %498 = vmatpush.msra.mxu3 %v231_v8  ;;  %394 = vmatmul.f32.vlgmr.msrb.gmra.mxu1 %v1182_v9  ;;  %v143_v61 = vld [vmem:[#allocation2 + $0x238] sm:$0xff]  ;;  %v205_v0 = vld [vmem:[#allocation2 + $0x428] sm:$0xff] }
  0x53   :  { %453 = vmatpush.msra.mxu2 %v105_v10  ;;  %478 = vmatpush.msra.mxu1 %v199_v16  ;;  %v239_v1 = vld [vmem:[#allocation2 + $0x538] sm:$0xff]  ;;  %v141_v2 = vld [vmem:[#allocation2 + $0x228] sm:$0xff] }
  0x54   :  { %499 = vmatpush.msra.mxu3 %v229_v14  ;;  %459 = vmatpush.msra.mxu0 %v165_v17  ;;  %v175_v4 = vld [vmem:[#allocation2 + $0x338] sm:$0xff]  ;;  %v237_v7 = vld [vmem:[#allocation2 + $0x528] sm:$0xff] }
  0x55   :  { %518 = vmatpush.msrb.mxu2 %v263_v15  ;;  %479 = vmatpush.msra.mxu1 %v197_v21  ;;  %v203_v5 = vld [vmem:[#allocation2 + $0x418] sm:$0xff]  ;;  %v201_v10 = vld [vmem:[#allocation2 + $0x408] sm:$0xff]  ;;  %v594_v21 = vld [vmem:[%s1503_s3 + $0xc0] sm:$0xff] }
  0x56   :  { %500 = vmatpush.msra.mxu3 %v227_v19  ;;  %460 = vmatpush.msra.mxu0 %v163_v22  ;;  %v139_v8 = vld [vmem:[#allocation2 + $0x218] sm:$0xff]  ;;  %v137_v14 = vld [vmem:[#allocation2 + $0x208] sm:$0xff] }
  0x57   :  { %519 = vmatpush.msrb.mxu2 %v261_v20  ;;  %480 = vmatpush.msra.mxu1 %v195_v25  ;;  %v235_v13 = vld [vmem:[#allocation2 + $0x518] sm:$0xff]  ;;  %v169_v17 = vld [vmem:[#allocation2 + $0x308] sm:$0xff]  ;;  %v590_v25 = vld [vmem:[%s1503_s3 + $0xa0] sm:$0xff] }
  0x58   :  { %501 = vmatpush.msra.mxu3 %v225_v23  ;;  %461 = vmatpush.msra.mxu0 %v161_v26  ;;  %v171_v15 = vld [vmem:[#allocation2 + $0x318] sm:$0xff]  ;;  %v265_v19 = vld [vmem:[#allocation2 + $0x608] sm:$0xff]  ;;  %v592_v23 = vld [vmem:[%s1503_s3 + $0xb0] sm:$0xff] }
  0x59   :  { %520 = vmatpush.msrb.mxu2 %v259_v24  ;;  %481 = vmatpush.msra.mxu1 %v193_v29  ;;  %v267_v16 = vld [vmem:[#allocation2 + $0x618] sm:$0xff]  ;;  %v595_v22 = vld [vmem:[%s1503_s3 + $0xc8] sm:$0xff]  ;;  %v586_v29 = vld [vmem:[%s1503_s3 + $0x80] sm:$0xff] }
  0x5a   :  { %502 = vmatpush.msra.mxu3 %v223_v27  ;;  %462 = vmatpush.msra.mxu0 %v159_v30  ;;  %v601_v20 = vld [vmem:[%s1503_s3 + $0xf8] sm:$0xff]  ;;  %v591_v26 = vld [vmem:[%s1503_s3 + $0xa8] sm:$0xff]  ;;  %v588_v27 = vld [vmem:[%s1503_s3 + $0x90] sm:$0xff] }
  0x5b   :  { %521 = vmatpush.msrb.mxu2 %v257_v28  ;;  %482 = vmatpush.msra.mxu1 %v191_v33  ;;  %v593_v24 = vld [vmem:[%s1503_s3 + $0xb8] sm:$0xff]  ;;  %v587_v30 = vld [vmem:[%s1503_s3 + $0x88] sm:$0xff]  ;;  %v582_v33 = vld [vmem:[%s1503_s3 + $0x60] sm:$0xff] }
  0x5c   :  { %503 = vmatpush.msra.mxu3 %v221_v31  ;;  %463 = vmatpush.msra.mxu0 %v157_v34  ;;  %v589_v28 = vld [vmem:[%s1503_s3 + $0x98] sm:$0xff]  ;;  %v584_v31 = vld [vmem:[%s1503_s3 + $0x70] sm:$0xff]  ;;  %v583_v34 = vld [vmem:[%s1503_s3 + $0x68] sm:$0xff] }
  0x5d   :  { %522 = vmatpush.msrb.mxu2 %v255_v32  ;;  %483 = vmatpush.msra.mxu1 %v189_v37  ;;  %v585_v32 = vld [vmem:[%s1503_s3 + $0x78] sm:$0xff]  ;;  %v578_v37 = vld [vmem:[%s1503_s3 + $0x40] sm:$0xff] }
  0x5e   :  { %504 = vmatpush.msra.mxu3 %v219_v35  ;;  %464 = vmatpush.msra.mxu0 %v155_v38  ;;  %v580_v35 = vld [vmem:[%s1503_s3 + $0x50] sm:$0xff]  ;;  %v579_v38 = vld [vmem:[%s1503_s3 + $0x48] sm:$0xff] }
  0x5f   :  { %523 = vmatpush.msrb.mxu2 %v253_v36  ;;  %484 = vmatpush.msra.mxu1 %v187_v41  ;;  %v581_v36 = vld [vmem:[%s1503_s3 + $0x58] sm:$0xff]  ;;  %v574_v41 = vld [vmem:[%s1503_s3 + $0x20] sm:$0xff] }
  0x60   :  { %505 = vmatpush.msra.mxu3 %v217_v39  ;;  %465 = vmatpush.msra.mxu0 %v153_v42  ;;  %v576_v39 = vld [vmem:[%s1503_s3 + $0x30] sm:$0xff]  ;;  %v575_v42 = vld [vmem:[%s1503_s3 + $0x28] sm:$0xff] }
  0x61   :  { %524 = vmatpush.msrb.mxu2 %v251_v40  ;;  %485 = vmatpush.msra.mxu1 %v185_v45  ;;  %v577_v40 = vld [vmem:[%s1503_s3 + $0x38] sm:$0xff]  ;;  %v570_v45 = vld [vmem:[%s1503_s3] sm:$0xff] }
  0x62   :  { %506 = vmatpush.msra.mxu3 %v215_v43  ;;  %466 = vmatpush.msra.mxu0 %v151_v46  ;;  %v572_v43 = vld [vmem:[%s1503_s3 + $0x10] sm:$0xff]  ;;  %v571_v46 = vld [vmem:[%s1503_s3 + $0x8] sm:$0xff] }
  0x63   :  { %525 = vmatpush.msrb.mxu2 %v249_v44  ;;  %486 = vmatpush.msra.mxu1 %v183_v49  ;;  %v573_v44 = vld [vmem:[%s1503_s3 + $0x18] sm:$0xff] }
  0x64   :  { %507 = vmatpush.msra.mxu3 %v213_v47  ;;  %467 = vmatpush.msra.mxu0 %v149_v50  ;;  %v1292_v47 = vld [vmem:[%s1502_s2] sm:$0x3]  ;;  %v633_v49 = vld [vmem:[%s1503_s3 + $0x1f8] sm:$0xff] }
  0x65   :  { %526 = vmatpush.msrb.mxu2 %v247_v48  ;;  %487 = vmatpush.msra.mxu1 %v181_v53  ;;  %v632_v48 = vld [vmem:[%s1503_s3 + $0x1f0] sm:$0xff]  ;;  %v630_v50 = vld [vmem:[%s1503_s3 + $0x1e0] sm:$0xff] }
  0x66   :  { %508 = vmatpush.msra.mxu3 %v211_v51  ;;  %468 = vmatpush.msra.mxu0 %v147_v54  ;;  %v631_v51 = vld [vmem:[%s1503_s3 + $0x1e8] sm:$0xff]  ;;  %v628_v53 = vld [vmem:[%s1503_s3 + $0x1d0] sm:$0xff]  ;;  %v629_v54 = vld [vmem:[%s1503_s3 + $0x1d8] sm:$0xff] }
  0x67   :  { %527 = vmatpush.msrb.mxu2 %v245_v52  ;;  %434 = vmatmul.f32.vlgmr.msrb.gmra.mxu3 %v1150_v11  ;;  %v173_v11 = vld [vmem:[#allocation2 + $0x328] sm:$0xff]  ;;  %v270_v52 = vperm.slane %v1292_v47, 0 }
  0x68   :  { %509 = vmatpush.msra.mxu3 %v209_v55  ;;  %469 = vmatpush.msra.mxu0 %v145_v57  ;;  %v627_v57 = vld [vmem:[%s1503_s3 + $0x1c8] sm:$0xff] }
  0x69   :  { %528 = vmatpush.msrb.mxu2 %v243_v56  ;;  %488 = vmatpush.msra.mxu1 %v179_v58  ;;  %v626_v56 = vld [vmem:[%s1503_s3 + $0x1c0] sm:$0xff] }
  0x6a   :  { %510 = vmatpush.msra.mxu3 %v207_v59  ;;  %454 = vmatmul.f32.vlgmr.msra.gmra.mxu2 %v1163_v18  ;;  %v233_v18 = vld [vmem:[#allocation2 + $0x508] sm:$0xff]  ;;  %v624_v59 = vld [vmem:[%s1503_s3 + $0x1b0] sm:$0xff] }
  0x6b   :  { %529 = vmatpush.msrb.mxu2 %v241_v60  ;;  %470 = vmatpush.msra.mxu0 %v143_v61  ;;  %v625_v60 = vld [vmem:[%s1503_s3 + $0x1b8] sm:$0xff] }
  0x6c   :  { %489 = vmatpush.msra.mxu1 %v177_v63  ;;  %511 = vmatpush.msra.mxu3 %v205_v0  ;;  %v622_v63 = vld [vmem:[%s1503_s3 + $0x1a0] sm:$0xff]  ;;  %v623_v0 = vld [vmem:[%s1503_s3 + $0x1a8] sm:$0xff] }
  0x6d   :  { %530 = vmatpush.msrb.mxu2 %v239_v1  ;;  %471 = vmatpush.msra.mxu0 %v141_v2 }
  0x6e   :  { %490 = vmatpush.msra.mxu1 %v175_v4  ;;  %512 = vmatpush.msra.mxu3 %v203_v5 }
  0x6f   :  { %531 = vmatpush.msrb.mxu2 %v237_v7  ;;  %472 = vmatpush.msra.mxu0 %v139_v8 }
  0x70   :  { %491 = vmatpush.msra.mxu1 %v173_v11  ;;  %513 = vmatpush.msra.mxu3 %v201_v10  ;;  %v620_v11 = vld [vmem:[%s1503_s3 + $0x190] sm:$0xff]  ;;  %v621_v10 = vld [vmem:[%s1503_s3 + $0x198] sm:$0xff] }
  0x71   :  { %532 = vmatpush.msrb.mxu2 %v235_v13  ;;  %514 = vmatmul.f32.vlgmr.msra.gmra.mxu3 %v1174_v3  ;;  %v600_v3 = vld [vmem:[%s1503_s3 + $0xf0] sm:$0xff] }
  0x72   :  { %473 = vmatpush.msra.mxu0 %v137_v14  ;;  %492 = vmatpush.msra.mxu1 %v171_v15  ;;  %v618_v14 = vld [vmem:[%s1503_s3 + $0x180] sm:$0xff]  ;;  %v619_v15 = vld [vmem:[%s1503_s3 + $0x188] sm:$0xff] }
  0x73   :  { %533 = vmatpush.msrb.mxu2 %v233_v18  ;;  %474 = vmatmul.f32.vlgmr.msra.gmra.mxu0 %v1145_v6  ;;  %v598_v6 = vld [vmem:[%s1503_s3 + $0xe0] sm:$0xff] }
  0x74   :  { %534 = vmatmul.f32.vlgmr.msrb.gmra.mxu2 %v1182_v9  ;;  %552 = vmatpush.msrb.mxu0 %v267_v16  ;;  %v597_v9 = vld [vmem:[%s1503_s3 + $0xd8] sm:$0xff] }
  0x75   :  { %493 = vmatpush.msra.mxu1 %v169_v17  ;;  %660 = vmatpush.msrb.mxu3 %v632_v48 }
  0x76   :  { %494 = vmatmul.f32.vlgmr.msra.gmra.mxu1 %v1156_v12  ;;  %553 = vmatpush.msrb.mxu0 %v265_v19  ;;  %v599_v12 = vld [vmem:[%s1503_s3 + $0xe8] sm:$0xff]  ;;  %v616_v19 = vld [vmem:[%s1503_s3 + $0x170] sm:$0xff] }
  0x77   :  { %640 = vmatpush.msrb.mxu1 %v600_v3  ;;  %700 = vmatpush.msra.mxu2 %v633_v49  ;;  %v617_v3 = vld [vmem:[%s1503_s3 + $0x178] sm:$0xff] }
  0x78   :  { %680 = vmatpush.msra.mxu0 %v601_v20  ;;  %661 = vmatpush.msrb.mxu3 %v630_v50 }
  0x79   :  { %641 = vmatpush.msrb.mxu1 %v598_v6  ;;  %701 = vmatpush.msra.mxu2 %v631_v51  ;;  %v614_v6 = vld [vmem:[%s1503_s3 + $0x160] sm:$0xff] }
  0x7a   :  { %681 = vmatpush.msra.mxu0 %v599_v12  ;;  %662 = vmatpush.msrb.mxu3 %v628_v53  ;;  %v615_v12 = vld [vmem:[%s1503_s3 + $0x168] sm:$0xff] }
  0x7b   :  { %990 = vmatmul.msk.f32.vlgmr.msrb.gmra.mxu0 %vm274_vm0, %v1169_v62  ;;  %v596_v62 = vld [vmem:[%s1503_s3 + $0xd0] sm:$0xff]  ;;  %702 = vmatpush.msra.mxu2 %v629_v54 }
  0x7c   :  { %642 = vmatpush.msrb.mxu1 %v596_v62  ;;  %682 = vmatpush.msra.mxu0 %v597_v9  ;;  %v762_v54 = vld [vmem:[#allocation5 + $0xf0] sm:$0xff] }
  0x7d   :  { %663 = vmatpush.msrb.mxu3 %v626_v56  ;;  %703 = vmatpush.msra.mxu2 %v627_v57  ;;  %v763_v56 = vld [vmem:[#allocation5 + $0xf8] sm:$0xff] }
  0x7e   :  { %643 = vmatpush.msrb.mxu1 %v594_v21  ;;  %683 = vmatpush.msra.mxu0 %v595_v22  ;;  %v612_v21 = vld [vmem:[%s1503_s3 + $0x150] sm:$0xff]  ;;  %v613_v22 = vld [vmem:[%s1503_s3 + $0x158] sm:$0xff] }
  0x7f   :  { %664 = vmatpush.msrb.mxu3 %v624_v59  ;;  %704 = vmatpush.msra.mxu2 %v625_v60  ;;  %v795_v57 = vld [vmem:[#allocation5 + $0x1f8] sm:$0xff]  ;;  %v792_v59 = vld [vmem:[#allocation5 + $0x1e0] sm:$0xff]  ;;  %v761_v60 = vld [vmem:[#allocation5 + $0xe8] sm:$0xff] }
  0x80   :  { %644 = vmatpush.msrb.mxu1 %v592_v23  ;;  %684 = vmatpush.msra.mxu0 %v593_v24  ;;  %v610_v24 = vld [vmem:[%s1503_s3 + $0x140] sm:$0xff] }
  0x81   :  { %665 = vmatpush.msrb.mxu3 %v622_v63  ;;  %705 = vmatpush.msra.mxu2 %v623_v0  ;;  %v758_v63 = vld [vmem:[#allocation5 + $0xd0] sm:$0xff] }
  0x82   :  { %645 = vmatpush.msrb.mxu1 %v590_v25  ;;  %685 = vmatpush.msra.mxu0 %v591_v26  ;;  %v611_v25 = vld [vmem:[%s1503_s3 + $0x148] sm:$0xff]  ;;  %v790_v0 = vld [vmem:[#allocation5 + $0x1d0] sm:$0xff] }
  0x83   :  { %666 = vmatpush.msrb.mxu3 %v620_v11  ;;  %706 = vmatpush.msra.mxu2 %v621_v10  ;;  %v754_v11 = vld [vmem:[#allocation5 + $0xb0] sm:$0xff] }
  0x84   :  { %646 = vmatpush.msrb.mxu1 %v588_v27  ;;  %686 = vmatpush.msra.mxu0 %v589_v28  ;;  %v608_v27 = vld [vmem:[%s1503_s3 + $0x130] sm:$0xff]  ;;  %v609_v28 = vld [vmem:[%s1503_s3 + $0x138] sm:$0xff] }
  0x85   :  { %667 = vmatpush.msrb.mxu3 %v618_v14  ;;  %707 = vmatpush.msra.mxu2 %v619_v15  ;;  %v786_v10 = vld [vmem:[#allocation5 + $0x1b0] sm:$0xff]  ;;  %v787_v14 = vld [vmem:[#allocation5 + $0x1b8] sm:$0xff]  ;;  %v752_v15 = vld [vmem:[#allocation5 + $0xa0] sm:$0xff] }
  0x86   :  { %647 = vmatpush.msrb.mxu1 %v586_v29  ;;  %687 = vmatpush.msra.mxu0 %v587_v30  ;;  %v606_v29 = vld [vmem:[%s1503_s3 + $0x120] sm:$0xff]  ;;  %v607_v30 = vld [vmem:[%s1503_s3 + $0x128] sm:$0xff] }
  0x87   :  { %668 = vmatpush.msrb.mxu3 %v616_v19  ;;  %708 = vmatpush.msra.mxu2 %v617_v3  ;;  %v750_v19 = vld [vmem:[#allocation5 + $0x90] sm:$0xff] }
  0x88   :  { %648 = vmatpush.msrb.mxu1 %v584_v31  ;;  %688 = vmatpush.msra.mxu0 %v585_v32  ;;  %v604_v31 = vld [vmem:[%s1503_s3 + $0x110] sm:$0xff]  ;;  %v605_v32 = vld [vmem:[%s1503_s3 + $0x118] sm:$0xff] }
  0x89   :  { %669 = vmatpush.msrb.mxu3 %v614_v6  ;;  %709 = vmatpush.msra.mxu2 %v615_v12  ;;  %v782_v3 = vld [vmem:[#allocation5 + $0x190] sm:$0xff]  ;;  %v783_v6 = vld [vmem:[#allocation5 + $0x198] sm:$0xff]  ;;  %v748_v12 = vld [vmem:[#allocation5 + $0x80] sm:$0xff] }
  0x8a   :  { %649 = vmatpush.msrb.mxu1 %v582_v33  ;;  %689 = vmatpush.msra.mxu0 %v583_v34  ;;  %v602_v33 = vld [vmem:[%s1503_s3 + $0x100] sm:$0xff]  ;;  %v603_v34 = vld [vmem:[%s1503_s3 + $0x108] sm:$0xff] }
  0x8b   :  { %670 = vmatpush.msrb.mxu3 %v612_v21  ;;  %710 = vmatpush.msra.mxu2 %v613_v22  ;;  %v781_v21 = vld [vmem:[#allocation5 + $0x188] sm:$0xff]  ;;  %v746_v22 = vld [vmem:[#allocation5 + $0x70] sm:$0xff] }
  0x8c   :  { %650 = vmatpush.msrb.mxu1 %v580_v35  ;;  %690 = vmatpush.msra.mxu0 %v581_v36  ;;  %v271_v35 = vperm.slane %v1292_v47, 1 }
  0x8d   :  { %671 = vmatpush.msrb.mxu3 %v610_v24  ;;  %711 = vmatpush.msra.mxu2 %v611_v25  ;;  %v747_v24 = vld [vmem:[#allocation5 + $0x78] sm:$0xff] }
  0x8e   :  { %651 = vmatpush.msrb.mxu1 %v578_v37  ;;  %691 = vmatpush.msra.mxu0 %v579_v38  ;;  %v779_v25 = vld [vmem:[#allocation5 + $0x178] sm:$0xff] }
  0x8f   :  { %672 = vmatpush.msrb.mxu3 %v608_v27  ;;  %712 = vmatpush.msra.mxu2 %v609_v28  ;;  %v776_v27 = vld [vmem:[#allocation5 + $0x160] sm:$0xff]  ;;  %v745_v28 = vld [vmem:[#allocation5 + $0x68] sm:$0xff] }
  0x90   :  { %652 = vmatpush.msrb.mxu1 %v576_v39  ;;  %692 = vmatpush.msra.mxu0 %v577_v40 }
  0x91   :  { %673 = vmatpush.msrb.mxu3 %v606_v29  ;;  %713 = vmatpush.msra.mxu2 %v607_v30  ;;  %v777_v29 = vld [vmem:[#allocation5 + $0x168] sm:$0xff]  ;;  %v742_v30 = vld [vmem:[#allocation5 + $0x50] sm:$0xff] }
  0x92   :  { %653 = vmatpush.msrb.mxu1 %v574_v41  ;;  %693 = vmatpush.msra.mxu0 %v575_v42 }
  0x93   :  { %674 = vmatpush.msrb.mxu3 %v604_v31  ;;  %714 = vmatpush.msra.mxu2 %v605_v32  ;;  %v774_v31 = vld [vmem:[#allocation5 + $0x150] sm:$0xff]  ;;  %v743_v32 = vld [vmem:[#allocation5 + $0x58] sm:$0xff] }
  0x94   :  { %654 = vmatpush.msrb.mxu1 %v572_v43  ;;  %694 = vmatpush.msra.mxu0 %v573_v44 }
  0x95   :  { %675 = vmatpush.msrb.mxu3 %v602_v33  ;;  %715 = vmatpush.msra.mxu2 %v603_v34  ;;  %v775_v33 = vld [vmem:[#allocation5 + $0x158] sm:$0xff]  ;;  %v740_v34 = vld [vmem:[#allocation5 + $0x40] sm:$0xff] }
  0x96   :  { %655 = vmatpush.msrb.mxu1 %v570_v45  ;;  %695 = vmatpush.msra.mxu0 %v571_v46 }
  0x97   :  { %862 = vmatpush.msrb.mxu2 %v795_v57  ;;  %v924_v57 = vld [vmem:[%s1507_s7 + $0xf0] sm:$0xff] }
  0x98   :  { %802 = vmatpush.msra.mxu1 %v762_v54  ;;  %842 = vmatpush.msrb.mxu0 %v763_v56  ;;  %v909_v54 = vld [vmem:[%s1507_s7 + $0x78] sm:$0xff]  ;;  %v908_v56 = vld [vmem:[%s1507_s7 + $0x70] sm:$0xff] }
  0x9a   :  { %843 = vmatpush.msrb.mxu0 %v761_v60  ;;  %v906_v60 = vld [vmem:[%s1507_s7 + $0x60] sm:$0xff] }
  0xb0   :  { %v295_v55 = vpop.f32.mrf.mxu0 }
  0xb1   :  { %v296_v58 = vadd.f32 %v295_v55, %v270_v52  ;;  %v794_v55 = vld [vmem:[#allocation5 + $0x1f0] sm:$0xff] }
  0xb2   :  { %822 = vmatpush.msra.mxu3 %v794_v55  ;;  %v925_v55 = vld [vmem:[%s1507_s7 + $0xf8] sm:$0xff] }
  0xb4   :  { %v315_v61 = vpop.f32.mrf.mxu1  ;;  %v335_v2 = vpop.f32.mrf.mxu2  ;;  %823 = vmatpush.msra.mxu3 %v792_v59  ;;  %v923_v59 = vld [vmem:[%s1507_s7 + $0xe8] sm:$0xff] }
  0xb5   :  { %v316_v1 = vadd.f32 %v315_v61, %v296_v58  ;;  %v760_v58 = vld [vmem:[#allocation5 + $0xe0] sm:$0xff]  ;;  %v793_v61 = vld [vmem:[#allocation5 + $0x1e8] sm:$0xff] }
  0xb6   :  { %803 = vmatpush.msra.mxu1 %v760_v58  ;;  %863 = vmatpush.msrb.mxu2 %v793_v61  ;;  %v907_v58 = vld [vmem:[%s1507_s7 + $0x68] sm:$0xff]  ;;  %v922_v61 = vld [vmem:[%s1507_s7 + $0xe0] sm:$0xff] }
  0xb7   :  { %v336_v4 = vadd.f32 %v335_v2, %v316_v1  ;;  %v355_v5 = vpop.f32.mrf.mxu3  ;;  %v759_v1 = vld [vmem:[#allocation5 + $0xd8] sm:$0xff]  ;;  %824 = vmatpush.msra.mxu3 %v790_v0 }
  0xb8   :  { %v791_v2 = vld [vmem:[#allocation5 + $0x1d8] sm:$0xff]  ;;  %804 = vmatpush.msra.mxu1 %v758_v63  ;;  %844 = vmatpush.msrb.mxu0 %v759_v1  ;;  %v904_v1 = vld [vmem:[%s1507_s7 + $0x50] sm:$0xff] }
  0xb9   :  { %v356_v7 = vadd.f32 %v355_v5, %v336_v4  ;;  %v756_v4 = vld [vmem:[#allocation5 + $0xc0] sm:$0xff]  ;;  %864 = vmatpush.msrb.mxu2 %v791_v2  ;;  %v905_v63 = vld [vmem:[%s1507_s7 + $0x58] sm:$0xff]  ;;  %v920_v2 = vld [vmem:[%s1507_s7 + $0xd0] sm:$0xff] }
  0xba   :  { %v788_v5 = vld [vmem:[#allocation5 + $0x1c0] sm:$0xff]  ;;  %805 = vmatpush.msra.mxu1 %v756_v4  ;;  %v921_v0 = vld [vmem:[%s1507_s7 + $0xd8] sm:$0xff]  ;;  %v903_v4 = vld [vmem:[%s1507_s7 + $0x48] sm:$0xff] }
  0xbb   :  { %825 = vmatpush.msra.mxu3 %v788_v5  ;;  %v919_v5 = vld [vmem:[%s1507_s7 + $0xc8] sm:$0xff] }
  0xbc   :  { %806 = vmatpush.msra.mxu1 %v754_v11  ;;  %v901_v11 = vld [vmem:[%s1507_s7 + $0x38] sm:$0xff] }
  0xbd   :  { %826 = vmatpush.msra.mxu3 %v786_v10  ;;  %v917_v10 = vld [vmem:[%s1507_s7 + $0xb8] sm:$0xff] }
  0xbe   :  { %807 = vmatpush.msra.mxu1 %v752_v15 }
  0xc0   :  { %808 = vmatpush.msra.mxu1 %v750_v19 }
  0xc2   :  { %809 = vmatpush.msra.mxu1 %v748_v12 }
  0xc4   :  { %810 = vmatpush.msra.mxu1 %v746_v22 }
  0xcc   :  { %v375_v8 = vpop.f32.mrf.mxu0 }
  0xcd   :  { %v376_v13 = vadd.f32 %v375_v8, %v356_v7  ;;  %v757_v7 = vld [vmem:[#allocation5 + $0xc8] sm:$0xff] }
  0xce   :  { %v789_v8 = vld [vmem:[#allocation5 + $0x1c8] sm:$0xff]  ;;  %845 = vmatpush.msrb.mxu0 %v757_v7  ;;  %v902_v7 = vld [vmem:[%s1507_s7 + $0x40] sm:$0xff] }
  0xcf   :  { %v395_v18 = vpop.f32.mrf.mxu1  ;;  %865 = vmatpush.msrb.mxu2 %v789_v8  ;;  %v918_v8 = vld [vmem:[%s1507_s7 + $0xc0] sm:$0xff] }
  0xd0   :  { %v396_v16 = vadd.f32 %v395_v18, %v376_v13  ;;  %v415_v17 = vpop.f32.mrf.mxu2  ;;  %v755_v13 = vld [vmem:[#allocation5 + $0xb8] sm:$0xff]  ;;  %v784_v18 = vld [vmem:[#allocation5 + $0x1a0] sm:$0xff] }
  0xd1   :  { %846 = vmatpush.msrb.mxu0 %v755_v13  ;;  %866 = vmatpush.msrb.mxu2 %v787_v14  ;;  %v634_v13 = vld [vmem:[%s1504_s4] sm:$0x3] }
  0xd2   :  { %v416_v20 = vadd.f32 %v415_v17, %v396_v16  ;;  %v753_v16 = vld [vmem:[#allocation5 + $0xa8] sm:$0xff]  ;;  %827 = vmatpush.msra.mxu3 %v784_v18  ;;  %v636_v14 = vperm.slane %v634_v13, 0  ;;  %v637_v15 = vperm.slane %v634_v13, 1 }
  0xd3   :  { %v785_v17 = vld [vmem:[#allocation5 + $0x1a8] sm:$0xff]  ;;  %847 = vmatpush.msrb.mxu0 %v753_v16 }
  0xd4   :  { %v991_v62 = vadd.f32 -0.5, %v416_v20  ;;  %vm562_vm1 = vcmp.lt.f32.partialorder %v416_v20, -0.5  ;;  %v564_v9 = vadd.f32 0.5, %v416_v20  ;;  %vm558_vm2 = vcmp.gt.f32.partialorder %v416_v20, 0.5  ;;  %v751_v20 = vld [vmem:[#allocation5 + $0x98] sm:$0xff]  ;;  %867 = vmatpush.msrb.mxu2 %v785_v17  ;;  %828 = vmatpush.msra.mxu3 %v782_v3 }
  0xd5   :  { %848 = vmatpush.msrb.mxu0 %v751_v20 }
  0xd6   :  { %v566_v23 = vsel %vm562_vm1, %v564_v9, 0.0  ;;  %v749_v9 = vld [vmem:[#allocation5 + $0x88] sm:$0xff]  ;;  %868 = vmatpush.msrb.mxu2 %v783_v6 }
  0xd7   :  { %v568_v26 = vsel %vm558_vm2, %v991_v62, %v566_v23  ;;  %v780_v62 = vld [vmem:[#allocation5 + $0x180] sm:$0xff]  ;;  %v778_v23 = vld [vmem:[#allocation5 + $0x170] sm:$0xff]  ;;  %849 = vmatpush.msrb.mxu0 %v749_v9 }
  0xd8   :  { %656 = vmatmul.f32.vlgmr.msrb.gmra.mxu1 %v568_v26  ;;  %696 = vmatmul.f32.vlgmr.msra.gmra.mxu0 %v568_v26  ;;  %v744_v26 = vld [vmem:[#allocation5 + $0x60] sm:$0xff] }
  0xd9   :  { %829 = vmatpush.msra.mxu3 %v780_v62  ;;  %869 = vmatpush.msrb.mxu2 %v781_v21 }
  0xda   :  { %850 = vmatpush.msrb.mxu0 %v747_v24  ;;  %811 = vmatpush.msra.mxu1 %v744_v26 }
  0xdb   :  { %830 = vmatpush.msra.mxu3 %v778_v23  ;;  %870 = vmatpush.msrb.mxu2 %v779_v25 }
  0xdc   :  { %851 = vmatpush.msrb.mxu0 %v745_v28  ;;  %812 = vmatpush.msra.mxu1 %v742_v30  ;;  %v916_v28 = vld [vmem:[%s1507_s7 + $0xb0] sm:$0xff]  ;;  %v915_v30 = vld [vmem:[%s1507_s7 + $0xa8] sm:$0xff] }
  0xdd   :  { %831 = vmatpush.msra.mxu3 %v776_v27  ;;  %871 = vmatpush.msrb.mxu2 %v777_v29  ;;  %v900_v27 = vld [vmem:[%s1507_s7 + $0x30] sm:$0xff]  ;;  %v899_v29 = vld [vmem:[%s1507_s7 + $0x28] sm:$0xff] }
  0xde   :  { %852 = vmatpush.msrb.mxu0 %v743_v32  ;;  %813 = vmatpush.msra.mxu1 %v740_v34  ;;  %v914_v32 = vld [vmem:[%s1507_s7 + $0xa0] sm:$0xff]  ;;  %v913_v34 = vld [vmem:[%s1507_s7 + $0x98] sm:$0xff] }
  0xdf   :  { %832 = vmatpush.msra.mxu3 %v774_v31  ;;  %872 = vmatpush.msrb.mxu2 %v775_v33  ;;  %v898_v31 = vld [vmem:[%s1507_s7 + $0x20] sm:$0xff]  ;;  %v897_v33 = vld [vmem:[%s1507_s7 + $0x18] sm:$0xff] }
  0xea   :  { %v435_v36 = vpop.f32.mrf.mxu3 }
  0xeb   :  { %v436_v37 = vadd.f32 %v435_v36, %v271_v35  ;;  %v772_v35 = vld [vmem:[#allocation5 + $0x140] sm:$0xff]  ;;  %v741_v36 = vld [vmem:[#allocation5 + $0x48] sm:$0xff] }
  0xec   :  { %833 = vmatpush.msra.mxu3 %v772_v35  ;;  %853 = vmatpush.msrb.mxu0 %v741_v36  ;;  %v896_v35 = vld [vmem:[%s1507_s7 + $0x10] sm:$0xff] }
  0xed   :  { %v455_v38 = vpop.f32.mrf.mxu2  ;;  %v912_v36 = vld [vmem:[%s1507_s7 + $0x90] sm:$0xff] }
  0xee   :  { %v456_v39 = vadd.f32 %v455_v38, %v436_v37  ;;  %v773_v37 = vld [vmem:[#allocation5 + $0x148] sm:$0xff]  ;;  %v738_v38 = vld [vmem:[#allocation5 + $0x30] sm:$0xff] }
  0xef   :  { %873 = vmatpush.msrb.mxu2 %v773_v37  ;;  %814 = vmatpush.msra.mxu1 %v738_v38  ;;  %v895_v37 = vld [vmem:[%s1507_s7 + $0x8] sm:$0xff] }
  0xf0   :  { %v475_v40 = vpop.f32.mrf.mxu0  ;;  %v911_v38 = vld [vmem:[%s1507_s7 + $0x88] sm:$0xff] }
  0xf1   :  { %v476_v41 = vadd.f32 %v475_v40, %v456_v39  ;;  %v770_v39 = vld [vmem:[#allocation5 + $0x130] sm:$0xff]  ;;  %v739_v40 = vld [vmem:[#allocation5 + $0x38] sm:$0xff] }
  0xf2   :  { %834 = vmatpush.msra.mxu3 %v770_v39  ;;  %854 = vmatpush.msrb.mxu0 %v739_v40  ;;  %v894_v39 = vld [vmem:[%s1507_s7] sm:$0xff] }
  0xf3   :  { %v495_v42 = vpop.f32.mrf.mxu1  ;;  %v910_v40 = vld [vmem:[%s1507_s7 + $0x80] sm:$0xff] }
  0xf4   :  { %v496_v43 = vadd.f32 %v495_v42, %v476_v41  ;;  %v515_v44 = vpop.f32.mrf.mxu3  ;;  %v771_v41 = vld [vmem:[#allocation5 + $0x138] sm:$0xff]  ;;  %v736_v42 = vld [vmem:[#allocation5 + $0x20] sm:$0xff] }
  0xf5   :  { %874 = vmatpush.msrb.mxu2 %v771_v41  ;;  %815 = vmatpush.msra.mxu1 %v736_v42  ;;  %v796_v41 = vld [vmem:[%s1506_s6] sm:$0x3] }
  0xf6   :  { %v516_v45 = vadd.f32 %v515_v44, %v496_v43  ;;  %v768_v43 = vld [vmem:[#allocation5 + $0x120] sm:$0xff]  ;;  %v737_v44 = vld [vmem:[#allocation5 + $0x28] sm:$0xff]  ;;  %v798_v42 = vperm.slane %v796_v41, 0 }
  0xf7   :  { %v535_v46 = vpop.f32.mrf.mxu2  ;;  %835 = vmatpush.msra.mxu3 %v768_v43  ;;  %855 = vmatpush.msrb.mxu0 %v737_v44  ;;  %v799_v43 = vperm.slane %v796_v41, 1 }
  0xf8   :  { %v536_v48 = vadd.f32 %v535_v46, %v516_v45  ;;  %v555_v49 = vpop.f32.mrf.mxu0  ;;  %v769_v45 = vld [vmem:[#allocation5 + $0x128] sm:$0xff]  ;;  %v734_v46 = vld [vmem:[#allocation5 + $0x10] sm:$0xff] }
  0xf9   :  { %875 = vmatpush.msrb.mxu2 %v769_v45  ;;  %816 = vmatpush.msra.mxu1 %v734_v46 }
  0xfa   :  { %v556_v50 = vadd.f32 %v555_v49, %v536_v48  ;;  %v766_v48 = vld [vmem:[#allocation5 + $0x110] sm:$0xff]  ;;  %v735_v49 = vld [vmem:[#allocation5 + $0x18] sm:$0xff] }
  0xfb   :  { %836 = vmatpush.msra.mxu3 %v766_v48  ;;  %856 = vmatpush.msrb.mxu0 %v735_v49 }
  0xfc   :  { %v992_v51 = vadd.f32 -0.5, %v556_v50  ;;  %vm563_vm3 = vcmp.lt.f32.partialorder %v556_v50, -0.5  ;;  %v565_v52 = vadd.f32 0.5, %v556_v50  ;;  %vm559_vm4 = vcmp.gt.f32.partialorder %v556_v50, 0.5  ;;  %v767_v50 = vld [vmem:[#allocation5 + $0x118] sm:$0xff] }
  0xfd   :  { %876 = vmatpush.msrb.mxu2 %v767_v50 }
  0xfe   :  { %v567_v53 = vsel %vm563_vm3, %v565_v52, 0.0  ;;  %v764_v52 = vld [vmem:[#allocation5 + $0x100] sm:$0xff] }
  0xff   :  { %v569_v47 = vsel %vm559_vm4, %v992_v51, %v567_v53  ;;  %v732_v51 = vld [vmem:[#allocation5] sm:$0xff]  ;;  %v733_v53 = vld [vmem:[#allocation5 + $0x8] sm:$0xff]  ;;  %837 = vmatpush.msra.mxu3 %v764_v52 }
 0x100   :  { %676 = vmatmul.f32.vlgmr.msrb.gmra.mxu3 %v569_v47  ;;  %716 = vmatmul.f32.vlgmr.msra.gmra.mxu2 %v569_v47  ;;  %v765_v47 = vld [vmem:[#allocation5 + $0x108] sm:$0xff] }
 0x101   :  { %817 = vmatpush.msra.mxu1 %v732_v51  ;;  %857 = vmatpush.msrb.mxu0 %v733_v53 }
 0x102   :  { %877 = vmatpush.msrb.mxu2 %v765_v47  ;;  %950 = vmatpush.msrb.mxu3 %v925_v55 }
 0x103   :  { %930 = vmatpush.msrb.mxu1 %v909_v54 }
 0x104   :  { %951 = vmatpush.msrb.mxu3 %v924_v57 }
 0x105   :  { %931 = vmatpush.msrb.mxu1 %v908_v56 }
 0x106   :  { %952 = vmatpush.msrb.mxu3 %v923_v59 }
 0x107   :  { %932 = vmatpush.msrb.mxu1 %v907_v58 }
 0x108   :  { %953 = vmatpush.msrb.mxu3 %v922_v61 }
 0x109   :  { %933 = vmatpush.msrb.mxu1 %v906_v60  ;;  %v1002_v60 = vld [vmem:[%s1508_s8] ss:$0 sm:$0xff] }
 0x10a   :  { %954 = vmatpush.msrb.mxu3 %v921_v0 }
 0x10b   :  { %934 = vmatpush.msrb.mxu1 %v905_v63 }
 0x10c   :  { %955 = vmatpush.msrb.mxu3 %v920_v2 }
 0x10d   :  { %935 = vmatpush.msrb.mxu1 %v904_v1 }
 0x10e   :  { %956 = vmatpush.msrb.mxu3 %v919_v5 }
 0x10f   :  { %936 = vmatpush.msrb.mxu1 %v903_v4 }
 0x110   :  { %957 = vmatpush.msrb.mxu3 %v918_v8 }
 0x111   :  { %937 = vmatpush.msrb.mxu1 %v902_v7 }
 0x112   :  { %958 = vmatpush.msrb.mxu3 %v917_v10 }
 0x113   :  { %938 = vmatpush.msrb.mxu1 %v901_v11 }
 0x114   :  { %959 = vmatpush.msrb.mxu3 %v916_v28 }
 0x115   :  { %939 = vmatpush.msrb.mxu1 %v900_v27 }
 0x116   :  { %960 = vmatpush.msrb.mxu3 %v915_v30 }
 0x117   :  { %940 = vmatpush.msrb.mxu1 %v899_v29 }
 0x118   :  { %961 = vmatpush.msrb.mxu3 %v914_v32 }
 0x119   :  { %941 = vmatpush.msrb.mxu1 %v898_v31 }
 0x11a   :  { %962 = vmatpush.msrb.mxu3 %v913_v34 }
 0x11b   :  { %942 = vmatpush.msrb.mxu1 %v897_v33 }
 0x11c   :  { %963 = vmatpush.msrb.mxu3 %v912_v36 }
 0x11d   :  { %943 = vmatpush.msrb.mxu1 %v896_v35 }
 0x11e   :  { %964 = vmatpush.msrb.mxu3 %v911_v38 }
 0x11f   :  { %944 = vmatpush.msrb.mxu1 %v895_v37 }
 0x120   :  { %965 = vmatpush.msrb.mxu3 %v910_v40 }
 0x121   :  { %945 = vmatpush.msrb.mxu1 %v894_v39 }
 0x155   :  { %v657_v18 = vpop.f32.mrf.mxu1  ;;  %v697_v16 = vpop.f32.mrf.mxu0 }
 0x156   :  { %v658_v17 = vadd.f32 %v657_v18, %v636_v14  ;;  %v698_v19 = vadd.f32 %v697_v16, %v637_v15 }
 0x183   :  { %v677_v3 = vpop.f32.mrf.mxu3  ;;  %v717_v20 = vpop.f32.mrf.mxu2 }
 0x184   :  { %v678_v6 = vadd.f32 %v677_v3, %v658_v17  ;;  %v718_v12 = vadd.f32 %v717_v20, %v698_v19 }
 0x186   :  { %v993_v62 = vadd.f32 -0.5, %v678_v6  ;;  %vm724_vm5 = vcmp.lt.f32.partialorder %v678_v6, -0.5  ;;  %v726_v9 = vadd.f32 0.5, %v678_v6  ;;  %v994_v21 = vadd.f32 -0.5, %v718_v12 }
 0x187   :  { %vm725_vm6 = vcmp.lt.f32.partialorder %v718_v12, -0.5  ;;  %v727_v22 = vadd.f32 0.5, %v718_v12  ;;  %vm720_vm7 = vcmp.gt.f32.partialorder %v678_v6, 0.5  ;;  %vm721_vm8 = vcmp.gt.f32.partialorder %v718_v12, 0.5 }
 0x188   :  { %v728_v23 = vsel %vm724_vm5, %v726_v9, 0.0 }
 0x189   :  { %v730_v24 = vsel %vm720_vm7, %v993_v62, %v728_v23  ;;  %v729_v25 = vsel %vm725_vm6, %v727_v22, 0.0 }
 0x18a   :  { %818 = vmatmul.f32.vlgmr.msra.gmra.mxu1 %v730_v24  ;;  %v731_v26 = vsel %vm721_vm8, %v994_v21, %v729_v25  ;;  %858 = vmatmul.f32.vlgmr.msrb.gmra.mxu0 %v730_v24 }
 0x18b   :  { %838 = vmatmul.f32.vlgmr.msra.gmra.mxu3 %v731_v26  ;;  %878 = vmatmul.f32.vlgmr.msrb.gmra.mxu2 %v731_v26 }
 0x207   :  { %v819_v44 = vpop.f32.mrf.mxu1  ;;  %v859_v45 = vpop.f32.mrf.mxu0 }
 0x208   :  { %v820_v46 = vadd.f32 %v819_v44, %v798_v42  ;;  %v860_v48 = vadd.f32 %v859_v45, %v799_v43 }
 0x20e   :  { %v839_v49 = vpop.f32.mrf.mxu3  ;;  %v879_v50 = vpop.f32.mrf.mxu2 }
 0x20f   :  { %v840_v51 = vadd.f32 %v839_v49, %v820_v46  ;;  %v880_v52 = vadd.f32 %v879_v50, %v860_v48 }
 0x211   :  { %v995_v53 = vadd.f32 -0.5, %v840_v51  ;;  %vm886_vm9 = vcmp.lt.f32.partialorder %v840_v51, -0.5  ;;  %v888_v47 = vadd.f32 0.5, %v840_v51  ;;  %v996_v54 = vadd.f32 -0.5, %v880_v52 }
 0x212   :  { %vm887_vm10 = vcmp.lt.f32.partialorder %v880_v52, -0.5  ;;  %v889_v55 = vadd.f32 0.5, %v880_v52  ;;  %vm882_vm11 = vcmp.gt.f32.partialorder %v840_v51, 0.5  ;;  %vm883_vm12 = vcmp.gt.f32.partialorder %v880_v52, 0.5 }
 0x213   :  { %v890_v56 = vsel %vm886_vm9, %v888_v47, 0.0 }
 0x214   :  { %v892_v57 = vsel %vm882_vm11, %v995_v53, %v890_v56  ;;  %v891_v58 = vsel %vm887_vm10, %v889_v55, 0.0 }
 0x215   :  { %946 = vmatmul.f32.vlgmr.msrb.gmra.mxu1 %v892_v57  ;;  %v893_v59 = vsel %vm883_vm12, %v996_v54, %v891_v58 }
 0x216   :  { %966 = vmatmul.f32.vlgmr.msrb.gmra.mxu3 %v893_v59 }
 0x292   :  { %v947_v61 = vpop.f32.mrf.mxu1 }
 0x293   :  { %v948_v63 = vadd.f32 %v1002_v60, %v947_v61 }
 0x299   :  { %v967_v0 = vpop.f32.mrf.mxu3 }
 0x29a   :  { %v968_v1 = vadd.f32 %v967_v0, %v948_v63 }
 0x29c   :  { %970 = vst [vmem:[#allocation7] sm:$0xff] %v968_v1 }
 0x29d   :  { %981 = dma.vmem_to_hbm [thread:$0]  %s977_s30, 128, %s979_s0, [#allocation4]  }
 0x29e   :  { %1079 = dma.done.wait [#allocation4], 128  }
 0x29f   :  { %1080 = vsyncadd [#allocation4], 4294967168 }
 0x2a0   :  { %986 = vsyncpa [#allocation3], 1 }
 0x2a1   :  { %987 = vsyncpa [#allocation6], 1 }
 0x2a2   :  { %988 = vsyncpa [#allocation4], 1 }

</bundles_post_ra>
